<compile_context>
chip_gen: v6e
topology: v6e:2x2x1
jax: 0.10.0
libtpu: 0.0.40
codegen_flags: <defaults>
</compile_context>

<pallas_src>
import functools
import math

import jax
import jax.numpy as jnp
from jax import lax
from jax.experimental import pallas as pl
from jax.experimental.pallas import tpu as pltpu


def _peg_kernel(x_ref, halo_ref, w_ref, b_ref, o_ref, *, C):
    """One (batch, row-tile) step of the depthwise 3x3 conv.

    x_ref:    (1, TH, W*C)    input row tile, lane-fused (W, C)
    halo_ref: (1, 1, 2, W*C)  row above / row below this tile (zeros at edges)
    w_ref:    (3, 3, W*C)     taps, pre-tiled across W, dw edge masks baked in
    b_ref:    (1, W*C)        bias, pre-tiled across W
    o_ref:    (1, TH, W*C)    output row tile
    """
    TH = o_ref.shape[1]
    WC = o_ref.shape[2]

    xr = x_ref[0].astype(jnp.float32)                         # dh = 1 (centre row)

    # dh = 0 / dh = 2 row taps: XLU sublane rotation, then swap the single
    # wrapped boundary row for the halo row (2 selects total per tile).
    row = lax.broadcasted_iota(jnp.int32, (TH, 1), 0)
    top = halo_ref[0, 0, pl.ds(0, 1), :].astype(jnp.float32)  # (1, WC)
    bot = halo_ref[0, 0, pl.ds(1, 1), :].astype(jnp.float32)  # (1, WC)
    x_up = jnp.where(row == 0, top, pltpu.roll(xr, shift=1, axis=0))
    x_dn = jnp.where(row == TH - 1, bot, pltpu.roll(xr, shift=TH - 1, axis=0))

    # Bias folded into the accumulator init (saves one full-tile add).
    acc = jnp.broadcast_to(b_ref[...].astype(jnp.float32), (TH, WC))

    for dh, xt in enumerate((x_up, xr, x_dn)):
        w_l = w_ref[dh, pl.ds(0, 1), :].astype(jnp.float32)   # dw = 0 (w==0 lanes zeroed)
        w_c = w_ref[dh, pl.ds(1, 1), :].astype(jnp.float32)   # dw = 1
        w_r = w_ref[dh, pl.ds(2, 1), :].astype(jnp.float32)   # dw = 2 (w==W-1 lanes zeroed)
        # Centre tap.
        acc = acc + xt * w_c
        # Left / right neighbours: lane rotation by +/-C (XLU).  The wrapped
        # lanes are killed by the pre-zeroed weight lanes, so no in-kernel
        # edge selects are needed.
        acc = acc + pltpu.roll(xt, shift=C, axis=1) * w_l
        acc = acc + pltpu.roll(xt, shift=WC - C, axis=1) * w_r

    o_ref[0] = acc.astype(o_ref.dtype)


def _pick_row_tile(H, WC, itemsize, B, target_bytes=1 << 20, min_tiles=2):
    """Row-tile height TH: divisor of H, multiple of the dtype sublane
    granularity, block <= target_bytes, and B * (H // TH) >= min_tiles so
    both v7x TensorCores get a grid step even at B = 1."""
    g = {4: 8, 2: 16, 1: 32}.get(itemsize, 8)
    if H % g != 0:
        # TODO(synk): ragged H (not a multiple of the sublane granularity)
        # falls back to a single whole-image row tile; very large such images
        # would need a pl.cdiv grid with a masked last tile.
        return H
    divisors = [th for th in range(g, H + 1, g) if H % th == 0]
    ok = [th for th in divisors
          if th * WC * itemsize <= target_bytes and B * (H // th) >= min_tiles]
    if ok:
        return max(ok)
    small = [th for th in divisors if B * (H // th) >= min_tiles]
    if small:
        return min(small)      # can't meet the VMEM target; keep >= 2 steps
    return min(divisors)       # can't meet min_tiles (e.g. B=1, H == g)


def peg_forward(x, weight, bias):
    """x: (B, N, C), weight: (3, 3, C), bias: (C,). Returns (B, N, C)."""
    B, N, C = x.shape
    H = math.isqrt(N)
    W = N // H
    assert H * W == N, "N must factor as H*W with H=isqrt(N)"
    WC = W * C

    # Lane-fused layout; these reshapes are free (W, C contiguous).
    x3 = x.reshape(B, H, WC)
    TH = _pick_row_tile(H, WC, x.dtype.itemsize, B)
    nH = H // TH

    # Halo rows per tile: the row above and the row below (zeros at the image
    # border).  A tiny strided gather (2 rows per tile), not a padded copy.
    zero_row = jnp.zeros((B, 1, WC), x.dtype)
    if nH > 1:
        tops = jnp.concatenate([zero_row, x3[:, TH - 1:H - 1:TH, :]], axis=1)
        bots = jnp.concatenate([x3[:, TH:H:TH, :], zero_row], axis=1)
    else:
        tops, bots = zero_row, zero_row
    halos = jnp.stack([tops, bots], axis=2)            # (B, nH, 2, WC)

    # Pre-tile the per-channel taps / bias across W (one-time, 9*W*C elems)
    # and bake the dw edge masks into the left/right taps:
    #   dw=0 tap contributes x[.., w-1, ..] -> zero its weight where w == 0,
    #   dw=2 tap contributes x[.., w+1, ..] -> zero its weight where w == W-1.
    wpos = jnp.arange(WC) // C                          # lane -> w
    w_lane = jnp.tile(weight, (1, 1, W))                # (3, 3, WC)
    w_lane = w_lane.at[:, 0, :].set(w_lane[:, 0, :] * (wpos >= 1).astype(w_lane.dtype))
    w_lane = w_lane.at[:, 2, :].set(w_lane[:, 2, :] * (wpos <= W - 2).astype(w_lane.dtype))
    b_lane = jnp.tile(bias, W).reshape(1, WC)           # (1, WC)

    kernel = functools.partial(_peg_kernel, C=C)
    out = pl.pallas_call(
        kernel,
        out_shape=jax.ShapeDtypeStruct((B, H, WC), x.dtype),
        grid=(B, nH),
        in_specs=[
            pl.BlockSpec((1, TH, WC), lambda b, i: (b, i, 0)),
            pl.BlockSpec((1, 1, 2, WC), lambda b, i: (b, i, 0, 0)),
            pl.BlockSpec((3, 3, WC), lambda b, i: (0, 0, 0)),
            pl.BlockSpec((1, WC), lambda b, i: (0, 0)),
        ],
        out_specs=pl.BlockSpec((1, TH, WC), lambda b, i: (b, i, 0)),
        compiler_params=pltpu.CompilerParams(
            dimension_semantics=("parallel", "parallel"),
            vmem_limit_bytes=32 * 1024 * 1024,
        ),
    )(x3, halos, w_lane, b_lane)

    return out.reshape(B, N, C)


def _reference(x, weight, bias):
    """Pure-JAX reference (same math, no Pallas) for a correctness check."""
    B, N, C = x.shape
    H = math.isqrt(N)
    W = N // H
    x4 = x.reshape(B, H, W, C).astype(jnp.float32)
    xp = jnp.pad(x4, ((0, 0), (1, 1), (1, 1), (0, 0)))
    acc = jnp.zeros((B, H, W, C), jnp.float32)
    for dh in range(3):
        for dw in range(3):
            acc = acc + xp[:, dh:dh + H, dw:dw + W, :] * weight[dh, dw, :].astype(jnp.float32)
    acc = acc + bias.astype(jnp.float32)
    return acc.reshape(B, N, C).astype(x.dtype)


if __name__ == "__main__":
    key = jax.random.PRNGKey(0)
    k_x, k_w, k_b = jax.random.split(key, 3)

    # Small shapes implied by the forward: x is (B, N, C) with N a perfect square.
    B, N, C = 2, 64, 32  # H = W = 8, dim = 32

    x = jax.random.normal(k_x, (B, N, C), dtype=jnp.float32)

    # Deterministic parameter init mirroring the PyTorch module:
    #   conv.weight: kaiming_normal_ on (dim, 1, 3, 3) -> std = sqrt(2 / 9),
    #   stored here channel-last as (3, 3, C).
    kaiming_std = math.sqrt(2.0 / 9.0)
    weight = jax.random.normal(k_w, (3, 3, C), dtype=jnp.float32) * kaiming_std
    #   conv.bias: normal(std=1e-6)
    bias = jax.random.normal(k_b, (C,), dtype=jnp.float32) * 1e-6

    out = peg_forward(x, weight, bias)
    jax.block_until_ready(out)

    ref = _reference(x, weight, bias)
    assert out.shape == (B, N, C)
    assert jnp.allclose(out, ref, atol=1e-5, rtol=1e-5), float(jnp.max(jnp.abs(out - ref)))

    print("KERNEL_OK")
</pallas_src>

<mosaic_0001>
module attributes {stable_mosaic.version = 11 : i64} {
  func.func @_peg_kernel(%arg0: i32, %arg1: i32, %arg2: memref<1x8x256xf32, #tpu.memory_space<vmem>>, %arg3: memref<1x1x2x256xf32, #tpu.memory_space<vmem>>, %arg4: memref<3x3x256xf32, #tpu.memory_space<vmem>>, %arg5: memref<1x256xf32, #tpu.memory_space<vmem>>, %arg6: memref<1x8x256xf32, #tpu.memory_space<vmem>>) attributes {dimension_semantics = [#tpu.dimension_semantics<parallel>, #tpu.dimension_semantics<parallel>], iteration_bounds = array<i64: 2, 1>, scalar_prefetch = 0 : i64, scratch_operands = 0 : i64, tpu.core_type = #tpu.core_type<tc>, window_params = [{transform_indices = @transform_0, window_bounds = array<i64: 1, 8, 256>}, {transform_indices = @transform_1, window_bounds = array<i64: 1, 1, 2, 256>}, {pipeline_mode = #tpu.pipeline_mode<synchronous>, transform_indices = @transform_2, window_bounds = array<i64: 3, 3, 256>}, {pipeline_mode = #tpu.pipeline_mode<synchronous>, transform_indices = @transform_3, window_bounds = array<i64: 1, 256>}, {transform_indices = @transform_4, window_bounds = array<i64: 1, 8, 256>}]} {
    %c0 = arith.constant 0 : index
    %c0_0 = arith.constant 0 : index
    %c0_1 = arith.constant 0 : index
    %0 = vector.load %arg2[%c0, %c0_0, %c0_1] : memref<1x8x256xf32, #tpu.memory_space<vmem>>, vector<1x8x256xf32>
    %1 = vector.shape_cast %0 : vector<1x8x256xf32> to vector<8x256xf32>
    %2 = tpu.iota {dimensions = array<i32: 0>} : vector<8x1xi32>
    %c0_2 = arith.constant 0 : index
    %c0_3 = arith.constant 0 : index
    %c0_4 = arith.constant 0 : index
    %c0_5 = arith.constant 0 : index
    %3 = vector.load %arg3[%c0_2, %c0_3, %c0_4, %c0_5] : memref<1x1x2x256xf32, #tpu.memory_space<vmem>>, vector<1x1x1x256xf32>
    %4 = vector.shape_cast %3 : vector<1x1x1x256xf32> to vector<1x256xf32>
    %c0_6 = arith.constant 0 : index
    %c0_7 = arith.constant 0 : index
    %c1 = arith.constant 1 : index
    %c0_8 = arith.constant 0 : index
    %5 = vector.load %arg3[%c0_6, %c0_7, %c1, %c0_8] : memref<1x1x2x256xf32, #tpu.memory_space<vmem>>, vector<1x1x1x256xf32>
    %6 = vector.shape_cast %5 : vector<1x1x1x256xf32> to vector<1x256xf32>
    %c0_i32 = arith.constant 0 : i32
    %7 = vector.broadcast %c0_i32 : i32 to vector<8x1xi32>
    %8 = arith.cmpi eq, %2, %7 : vector<8x1xi32>
    %c1_i32 = arith.constant 1 : i32
    %9 = tpu.dynamic_rotate %1 by %c1_i32 dim 0 : vector<8x256xf32>, i32 -> vector<8x256xf32>
    %10 = vector.shape_cast %8 : vector<8x1xi1> to vector<8x1xi1>
    %11 = vector.broadcast %10 : vector<8x1xi1> to vector<8x256xi1>
    %12 = vector.shape_cast %4 : vector<1x256xf32> to vector<1x256xf32>
    %13 = vector.broadcast %12 : vector<1x256xf32> to vector<8x256xf32>
    %14 = arith.select %11, %13, %9 : vector<8x256xi1>, vector<8x256xf32>
    %c7_i32 = arith.constant 7 : i32
    %15 = vector.broadcast %c7_i32 : i32 to vector<8x1xi32>
    %16 = arith.cmpi eq, %2, %15 : vector<8x1xi32>
    %c7_i32_9 = arith.constant 7 : i32
    %17 = tpu.dynamic_rotate %1 by %c7_i32_9 dim 0 : vector<8x256xf32>, i32 -> vector<8x256xf32>
    %18 = vector.shape_cast %16 : vector<8x1xi1> to vector<8x1xi1>
    %19 = vector.broadcast %18 : vector<8x1xi1> to vector<8x256xi1>
    %20 = vector.shape_cast %6 : vector<1x256xf32> to vector<1x256xf32>
    %21 = vector.broadcast %20 : vector<1x256xf32> to vector<8x256xf32>
    %22 = arith.select %19, %21, %17 : vector<8x256xi1>, vector<8x256xf32>
    %c0_10 = arith.constant 0 : index
    %c0_11 = arith.constant 0 : index
    %23 = vector.load %arg5[%c0_10, %c0_11] : memref<1x256xf32, #tpu.memory_space<vmem>>, vector<1x256xf32>
    %24 = vector.shape_cast %23 : vector<1x256xf32> to vector<1x256xf32>
    %25 = vector.broadcast %24 : vector<1x256xf32> to vector<8x256xf32>
    %c0_12 = arith.constant 0 : index
    %c0_13 = arith.constant 0 : index
    %c0_14 = arith.constant 0 : index
    %26 = vector.load %arg4[%c0_12, %c0_13, %c0_14] : memref<3x3x256xf32, #tpu.memory_space<vmem>>, vector<1x1x256xf32>
    %27 = vector.shape_cast %26 : vector<1x1x256xf32> to vector<1x256xf32>
    %c0_15 = arith.constant 0 : index
    %c1_16 = arith.constant 1 : index
    %c0_17 = arith.constant 0 : index
    %28 = vector.load %arg4[%c0_15, %c1_16, %c0_17] : memref<3x3x256xf32, #tpu.memory_space<vmem>>, vector<1x1x256xf32>
    %29 = vector.shape_cast %28 : vector<1x1x256xf32> to vector<1x256xf32>
    %c0_18 = arith.constant 0 : index
    %c2 = arith.constant 2 : index
    %c0_19 = arith.constant 0 : index
    %30 = vector.load %arg4[%c0_18, %c2, %c0_19] : memref<3x3x256xf32, #tpu.memory_space<vmem>>, vector<1x1x256xf32>
    %31 = vector.shape_cast %30 : vector<1x1x256xf32> to vector<1x256xf32>
    %32 = vector.broadcast %29 : vector<1x256xf32> to vector<8x256xf32>
    %33 = arith.mulf %14, %32 : vector<8x256xf32>
    %34 = arith.addf %25, %33 : vector<8x256xf32>
    %c32_i32 = arith.constant 32 : i32
    %35 = tpu.dynamic_rotate %14 by %c32_i32 dim 1 : vector<8x256xf32>, i32 -> vector<8x256xf32>
    %36 = vector.broadcast %27 : vector<1x256xf32> to vector<8x256xf32>
    %37 = arith.mulf %35, %36 : vector<8x256xf32>
    %38 = arith.addf %34, %37 : vector<8x256xf32>
    %c224_i32 = arith.constant 224 : i32
    %39 = tpu.dynamic_rotate %14 by %c224_i32 dim 1 : vector<8x256xf32>, i32 -> vector<8x256xf32>
    %40 = vector.broadcast %31 : vector<1x256xf32> to vector<8x256xf32>
    %41 = arith.mulf %39, %40 : vector<8x256xf32>
    %42 = arith.addf %38, %41 : vector<8x256xf32>
    %c1_20 = arith.constant 1 : index
    %c0_21 = arith.constant 0 : index
    %c0_22 = arith.constant 0 : index
    %43 = vector.load %arg4[%c1_20, %c0_21, %c0_22] : memref<3x3x256xf32, #tpu.memory_space<vmem>>, vector<1x1x256xf32>
    %44 = vector.shape_cast %43 : vector<1x1x256xf32> to vector<1x256xf32>
    %c1_23 = arith.constant 1 : index
    %c1_24 = arith.constant 1 : index
    %c0_25 = arith.constant 0 : index
    %45 = vector.load %arg4[%c1_23, %c1_24, %c0_25] : memref<3x3x256xf32, #tpu.memory_space<vmem>>, vector<1x1x256xf32>
    %46 = vector.shape_cast %45 : vector<1x1x256xf32> to vector<1x256xf32>
    %c1_26 = arith.constant 1 : index
    %c2_27 = arith.constant 2 : index
    %c0_28 = arith.constant 0 : index
    %47 = vector.load %arg4[%c1_26, %c2_27, %c0_28] : memref<3x3x256xf32, #tpu.memory_space<vmem>>, vector<1x1x256xf32>
    %48 = vector.shape_cast %47 : vector<1x1x256xf32> to vector<1x256xf32>
    %49 = vector.broadcast %46 : vector<1x256xf32> to vector<8x256xf32>
    %50 = arith.mulf %1, %49 : vector<8x256xf32>
    %51 = arith.addf %42, %50 : vector<8x256xf32>
    %c32_i32_29 = arith.constant 32 : i32
    %52 = tpu.dynamic_rotate %1 by %c32_i32_29 dim 1 : vector<8x256xf32>, i32 -> vector<8x256xf32>
    %53 = vector.broadcast %44 : vector<1x256xf32> to vector<8x256xf32>
    %54 = arith.mulf %52, %53 : vector<8x256xf32>
    %55 = arith.addf %51, %54 : vector<8x256xf32>
    %c224_i32_30 = arith.constant 224 : i32
    %56 = tpu.dynamic_rotate %1 by %c224_i32_30 dim 1 : vector<8x256xf32>, i32 -> vector<8x256xf32>
    %57 = vector.broadcast %48 : vector<1x256xf32> to vector<8x256xf32>
    %58 = arith.mulf %56, %57 : vector<8x256xf32>
    %59 = arith.addf %55, %58 : vector<8x256xf32>
    %c2_31 = arith.constant 2 : index
    %c0_32 = arith.constant 0 : index
    %c0_33 = arith.constant 0 : index
    %60 = vector.load %arg4[%c2_31, %c0_32, %c0_33] : memref<3x3x256xf32, #tpu.memory_space<vmem>>, vector<1x1x256xf32>
    %61 = vector.shape_cast %60 : vector<1x1x256xf32> to vector<1x256xf32>
    %c2_34 = arith.constant 2 : index
    %c1_35 = arith.constant 1 : index
    %c0_36 = arith.constant 0 : index
    %62 = vector.load %arg4[%c2_34, %c1_35, %c0_36] : memref<3x3x256xf32, #tpu.memory_space<vmem>>, vector<1x1x256xf32>
    %63 = vector.shape_cast %62 : vector<1x1x256xf32> to vector<1x256xf32>
    %c2_37 = arith.constant 2 : index
    %c2_38 = arith.constant 2 : index
    %c0_39 = arith.constant 0 : index
    %64 = vector.load %arg4[%c2_37, %c2_38, %c0_39] : memref<3x3x256xf32, #tpu.memory_space<vmem>>, vector<1x1x256xf32>
    %65 = vector.shape_cast %64 : vector<1x1x256xf32> to vector<1x256xf32>
    %66 = vector.broadcast %63 : vector<1x256xf32> to vector<8x256xf32>
    %67 = arith.mulf %22, %66 : vector<8x256xf32>
    %68 = arith.addf %59, %67 : vector<8x256xf32>
    %c32_i32_40 = arith.constant 32 : i32
    %69 = tpu.dynamic_rotate %22 by %c32_i32_40 dim 1 : vector<8x256xf32>, i32 -> vector<8x256xf32>
    %70 = vector.broadcast %61 : vector<1x256xf32> to vector<8x256xf32>
    %71 = arith.mulf %69, %70 : vector<8x256xf32>
    %72 = arith.addf %68, %71 : vector<8x256xf32>
    %c224_i32_41 = arith.constant 224 : i32
    %73 = tpu.dynamic_rotate %22 by %c224_i32_41 dim 1 : vector<8x256xf32>, i32 -> vector<8x256xf32>
    %74 = vector.broadcast %65 : vector<1x256xf32> to vector<8x256xf32>
    %75 = arith.mulf %73, %74 : vector<8x256xf32>
    %76 = arith.addf %72, %75 : vector<8x256xf32>
    %c0_42 = arith.constant 0 : index
    %c0_43 = arith.constant 0 : index
    %c0_44 = arith.constant 0 : index
    %77 = vector.load %arg6[%c0_42, %c0_43, %c0_44] : memref<1x8x256xf32, #tpu.memory_space<vmem>>, vector<1x8x256xf32>
    %78 = vector.shape_cast %77 : vector<1x8x256xf32> to vector<8x256xf32>
    %79 = vector.shape_cast %76 : vector<8x256xf32> to vector<1x8x256xf32>
    tpu.vector_store %arg6[%c0_42, %c0_43, %c0_44], %79 {strides = array<i32>} : memref<1x8x256xf32, #tpu.memory_space<vmem>>, vector<1x8x256xf32>,
    return
  }
  func.func @transform_0(%arg0: i32, %arg1: i32) -> (i32, i32, i32) {
    %c0_i32 = arith.constant 0 : i32
    %c0_i32_0 = arith.constant 0 : i32
    return %arg0, %arg1, %c0_i32 : i32, i32, i32
  }
  func.func @transform_1(%arg0: i32, %arg1: i32) -> (i32, i32, i32, i32) {
    %c0_i32 = arith.constant 0 : i32
    %c0_i32_0 = arith.constant 0 : i32
    %c0_i32_1 = arith.constant 0 : i32
    return %arg0, %arg1, %c0_i32, %c0_i32_0 : i32, i32, i32, i32
  }
  func.func @transform_2(%arg0: i32, %arg1: i32) -> (i32, i32, i32) {
    %c0_i32 = arith.constant 0 : i32
    %c0_i32_0 = arith.constant 0 : i32
    %c0_i32_1 = arith.constant 0 : i32
    %c0_i32_2 = arith.constant 0 : i32
    return %c0_i32, %c0_i32_0, %c0_i32_1 : i32, i32, i32
  }
  func.func @transform_3(%arg0: i32, %arg1: i32) -> (i32, i32) {
    %c0_i32 = arith.constant 0 : i32
    %c0_i32_0 = arith.constant 0 : i32
    %c0_i32_1 = arith.constant 0 : i32
    return %c0_i32, %c0_i32_0 : i32, i32
  }
  func.func @transform_4(%arg0: i32, %arg1: i32) -> (i32, i32, i32) {
    %c0_i32 = arith.constant 0 : i32
    %c0_i32_0 = arith.constant 0 : i32
    return %arg0, %arg1, %c0_i32 : i32, i32, i32
  }
}

</mosaic_0001>

<bundles_post_ra>
// kernel: tpu_custom_call.1
= control target key start
LH: loop header
LB: loop body
LE: loop exit
PB: predicated region body
PF: predicated region fallthrough
CT: control target
= control target key end

     0   :  { %s1261_s0 = inlined_call_operand.hbm [shape: f32[2,8,256], index: 0, kind: input, shape index: {}]   ;;  %s1262_s1 = inlined_call_operand.hbm [shape: f32[2,1,2,256], index: 1, kind: input, shape index: {}]   ;;  %s1263_s2 = inlined_call_operand.hbm [shape: f32[3,3,256], index: 2, kind: input, shape index: {}]   ;;  %s1264_s3 = inlined_call_operand.vmem [shape: f32[1,256], index: 3, kind: input, shape index: {}]   ;;  %s1265_s4 = inlined_call_operand.hbm [shape: f32[2,8,256], index: 4, kind: output, shape index: {}]  }
   0x1   :  { %1267 = sst [smem:[#allocation15_spill]] %s1261_s0 }
   0x2   :  { %1268 = sst [smem:[#allocation16_spill]] %s1263_s2 }
   0x3   :  { %9 = vsyncpa [#allocation3], 0 }
   0x4   :  { %11 = vsyncpa [#allocation3 + $0x1], 0 }
   0x5   :  { %12 = vsyncpa [#allocation6], 0 }
   0x6   :  { %14 = vsyncpa [#allocation6 + $0x1], 0 }
   0x7   :  { %15 = vsyncpa [#allocation4], 0 }
   0x8   :  { %17 = vsyncpa [#allocation4 + $0x1], 0  ;;  %s989_s15 = smov 0   ;;  %s991_s16 = smov 0  }
   0x9   :  { %s993_s17 = smov 0   ;;  %s995_s18 = smov 0  }
   0xa   :  { %s997_s19 = smov 0   ;;  %s999_s20 = smov 0  }
   0xb LB: > { %s1020_s21 = sadd.s32 4294967295, %s954_s20   ;;  %s678_s22 = sadd.s32 4294967294, %s954_s20   ;;  %s954_s20 = sphi %s999_s20, %s23_s20   ;;  %s950_s19 = sphi %s997_s19, %s1288_s19   ;;  %s946_s18 = sphi %s995_s18, %s1287_s18   ;;  %s942_s17 = sphi %s993_s17, %s1286_s17   ;;  %s938_s16 = sphi %s991_s16, %s1285_s16   ;;  %s934_s15 = sphi %s989_s15, %s1284_s15  }
   0xc   : > { %p57_p0 = scmp.ne.s32.totalorder %s938_s16, %s934_s15  ;;  %p58_p1 = scmp.eq.s32.totalorder %s1020_s21, 0 }
   0xd   : > { %p159_p3 = scmp.eq.s32.totalorder %s678_s22, 1  ;;  %p679_p5 = scmp.ge.s32.totalorder %s954_s20, 1 }
   0xe   : > { %p1029_p4 = por %p58_p1, %p57_p0  ;;  %p166_p7 = scmp.lt.s32.totalorder %s954_s20, 3 }
   0xf   : > { %p1034_p6 = por %p159_p3, %p57_p0  ;;  %s956_s26 = smov [#allocation7]  }
  0x10   : > { %p1039_p8 = pnand %p679_p5, %p166_p7  ;;  %s178_s27 = sshll.u32 %s956_s26, 4  ;;  %s179_s27 = int_to_ptr.vmem [resolvable:$true] %s178_s27 }
  0x11   : > { %s1270_s24 = scalar_select %p1034_p6, 1, 0 }
  0x12   : > { %p712_p9 = pneg %p1039_p8  ;;  %p681_p10 = scmp.ge.s32.totalorder %s954_s20, 2 }
  0x13   : > { %s35_s29 = sadd.s32 1, %s950_s19  ;;  %s795_s30 = scalar_lea.vmem %s179_s27, 384 }
  0x14   : > { %p1048_p11 = pnand %p712_p9, %p58_p1  ;;  %p796_p13 = scmp.ne.s32.totalorder %s179_s27, %s795_s30 }
  0x15   : > { %p803_p5 = scmp.lt.s32.totalorder %s179_s27, %s179_s27  ;;  %p804_p7 = scmp.lt.s32.totalorder %s795_s30, %s795_s30 }
  0x16   : > { %p786_p12 = pneg %p1048_p11 }
  0x17   : > { %p805_p2 = por %p804_p7, %p803_p5 }
  0x18   : > { %p798_p0 = pnand %p796_p13, %p786_p12 }
  0x1a   : > { %p799_p3 = pneg %p798_p0 }
  0x1c   : > { %p806_p6 = pnand %p805_p2, %p799_p3 }
  0x1e   : > { %809 = shalt.err (!%p806_p6)
}
  0x1f   : > { %s957_s5 = smov 128   ;;  %s958_s6 = smov 8  }
  0x20   : > { %s1273_s2 = sld [smem:[#allocation16_spill]]  ;;  %p37_p2 = scmp.ge.s32.totalorder %s35_s29, 2 }
  0x21   : > { %s44_s9 = sadd.s32 1, %s942_s17  ;;  %p51_p6 = scmp.ne.s32.totalorder %s942_s17, %s938_s16 }
  0x22   : > { %p52_p9 = scmp.eq.s32.totalorder %s954_s20, 0  ;;  %s1290_s29 = smov (%p37_p2, %s35_s29), 0 }
  0x23   : > { %1274 = sst [smem:[#allocation13_spill]] %s1290_s29  ;;  %p1276_p13 = scmp.eq.s32.totalorder %s1020_s21, 1 }
  0x24   : > { %p1066_p12 = por %p52_p9, %p51_p6  ;;  %s39_s12 = ssub.s32 %s950_s19, %s1290_s29 }
  0x25   : > { %p1072_p0 = por %p1276_p13, %p51_p6  ;;  %p42_p3 = scmp.eq.s32.totalorder %s39_s12, 0 }
  0x26   : > { %715 = dma.hbm_to_vmem [thread:$0]  (!%p1048_p11), %s1273_s2, 384, %s179_s27, [#allocation6], %s957_s5, %s957_s5, %s958_s6  }
  0x27   : > { %p728_p11 = scmp.lt.s32.totalorder %s954_s20, 2  ;;  %s1080_s13 = sand.u32 1, %s942_s17  }
  0x28   : > { %s682_s14 = sshll.u32 %s1080_s13, 4  ;;  %s699_s26 = sshll.u32 %s950_s19, 8 }
  0x29   : > { %s1084_s22 = scalar_select %p42_p3, %s942_s17, %s44_s9  }
  0x2a   : > { %s1279_s0 = sld [smem:[#allocation15_spill]]  ;;  %s199_s5 = scalar_lea.vmem [#allocation2], %s682_s14 }
  0x2b   : > { %1278 = sst [smem:[#allocation14_spill]] %s1084_s22  ;;  %s209_s6 = sshll.u32 %s199_s5, 4  ;;  %s210_s6 = int_to_ptr.vmem [resolvable:$true] %s209_s6 }
  0x2c   : > { %p1092_p5 = pnand %p728_p11, %p1066_p12  ;;  %s216_s8 = sand.u32 1, %s954_s20  }
  0x2d   : > { %s685_s12 = sshll.u32 %s1080_s13, 2  ;;  %s196_s2 = scalar_lea.sflag [#allocation3], %s1080_s13 }
  0x2e   : > { %p812_p7 = pneg %p1092_p5  ;;  %s823_s9 = scalar_lea.vmem %s210_s6, 256 }
  0x2f   : > { %p824_p2 = scmp.ne.s32.totalorder %s210_s6, %s823_s9  ;;  %s959_s14 = smov [#allocation2]  }
  0x30   : > { %s207_s30 = scalar_lea.hbm %s1279_s0, %s699_s26  ;;  %s828_s26 = sshll.u32 %s959_s14, 4  ;;  %s829_s26 = int_to_ptr.vmem [resolvable:$false] %s828_s26 }
  0x31   : > { %p826_p6 = pnand %p824_p2, %p812_p7  ;;  %s830_s10 = scalar_lea.vmem %s829_s26, 512 }
  0x32   : > { %p831_p12 = scmp.lt.s32.totalorder %s210_s6, %s829_s26  ;;  %p832_p13 = scmp.lt.s32.totalorder %s830_s10, %s823_s9 }
  0x33   : > { %p827_p9 = pneg %p826_p6 }
  0x34   : > { %p833_p11 = por %p832_p13, %p831_p12 }
  0x36   : > { %p834_p3 = pnand %p833_p11, %p827_p9 }
  0x38   : > { %837 = shalt.err (!%p834_p3)
}
  0x39   : > { %719 = dma.hbm_to_vmem [thread:$0]  (!%p1092_p5), %s207_s30, 256, %s210_s6, %s196_s2  }
  0x3a   : > { %s700_s13 = sshll.u32 %s950_s19, 6  ;;  %s220_s0 = scalar_lea.vmem [#allocation5], %s685_s12 }
  0x3b   : > { %s228_s5 = scalar_lea.hbm %s1262_s1, %s700_s13  ;;  %s230_s29 = sshll.u32 %s220_s0, 4  ;;  %s231_s29 = int_to_ptr.vmem [resolvable:$true] %s230_s29 }
  0x3c   : > { %s217_s14 = scalar_lea.sflag [#allocation6], %s216_s8  ;;  %s851_s22 = scalar_lea.vmem %s231_s29, 64 }
  0x3d   : > { %p852_p2 = scmp.ne.s32.totalorder %s231_s29, %s851_s22  ;;  %s960_s9 = smov [#allocation5]  }
  0x3e   : > { %s856_s26 = sshll.u32 %s960_s9, 4  ;;  %s857_s26 = int_to_ptr.vmem [resolvable:$false] %s856_s26 }
  0x3f   : > { %p854_p6 = pnand %p852_p2, %p812_p7  ;;  %s858_s10 = scalar_lea.vmem %s857_s26, 128 }
  0x40   : > { %p859_p12 = scmp.lt.s32.totalorder %s231_s29, %s857_s26  ;;  %p860_p13 = scmp.lt.s32.totalorder %s858_s10, %s851_s22 }
  0x41   : > { %p855_p9 = pneg %p854_p6 }
  0x42   : > { %p861_p11 = por %p860_p13, %p859_p12 }
  0x44   : > { %p862_p3 = pnand %p861_p11, %p855_p9 }
  0x46   : > { %865 = shalt.err (!%p862_p3)
}
  0x47   : > { %722 = dma.hbm_to_vmem [thread:$0]  (!%p1092_p5), %s228_s5, 64, %s231_s29, %s217_s14  }
  0x48   : > { %239 = sbr.rel (%p1039_p8) target bundleno = 245 (0xf5), region = 36  ;;  %s1118_s0 = sand.u32 (!%p1039_p8), 1, %s938_s16  }
  0x49   : > { %s689_s2 = sshll.u32 (!%p1039_p8), %s1118_s0, 4  ;;  %s242_s30 = scalar_lea.sflag (!%p1039_p8), [#allocation3], %s1118_s0 }
  0x4a   : > { %s245_s22 = scalar_lea.vmem (!%p1039_p8), [#allocation2], %s689_s2 }
  0x4d   : > { %917 = dma.done.wait (%p1029_p4), %s242_s30, 256  }
  0x4e   : > { %919 = vsyncadd (%p1029_p4), %s242_s30, 4294967040  ;;  %s250_s25 = sand.u32 1, %s1020_s21   ;;  %s690_s29 = sshll.u32 %s1118_s0, 2 }
  0x4f   : > { %s251_s6 = scalar_lea.sflag [#allocation6], %s250_s25  ;;  %s254_s7 = scalar_lea.vmem [#allocation5], %s690_s29 }
  0x50   : > { %921 = dma.done.wait (%p1029_p4), %s251_s6, 64  }
  0x51   : > { %923 = vsyncadd (%p1029_p4), %s251_s6, 4294967232 }
  0x52   : > { %925 = dma.done.wait (%p58_p1), [#allocation6], 384  }
  0x53   : > { %927 = vsyncadd (%p58_p1), [#allocation6], 4294966912  ;;  %v290_v0 = vlaneseq  ;;  %v289_v4 = vld [vmem:[%s245_s22 + $0x8] sm:$0xff]  ;;  %v288_v5 = vld [vmem:[%s245_s22] sm:$0xff]  ;;  %s961_s8 = smov 32   ;;  %s962_s12 = smov 96  }
  0x54   : > { %v292_v6 = vld [vmem:[%s254_s7] ss:$2 sm:$0x3]  ;;  %432 = vrot.lane.b32.xlu1 %v289_v4, %s961_s8  ;;  %v296_v7 = vrot.slane %v288_v5, 7  ;;  %v297_v14 = vrot.slane %v289_v4, 7  ;;  %v315_v19 = vrot.slane %v289_v4, 1 }
  0x55   : > { %v291_v1 = vshrl.u32 %v290_v0, 7  ;;  %v331_v9 = vld [vmem:[%s1264_s3] sm:$0x3]  ;;  %v345_v10 = vld [vmem:[#allocation7 + $0x1] ss:$4 sm:$0x3] }
  0x56   : > { %v693_v16 = vld [vmem:[%s254_s7 + $0x1] ss:$2 sm:$0x3]  ;;  %v475_v21 = vld [vmem:[#allocation7 + $0x11] ss:$4 sm:$0x3] }
  0x57   : > { %v1138_v2 = vsub.s32 0, %v291_v1  ;;  %v1140_v3 = vsub.s32 1, %v291_v1  ;;  %vm295_vm0 = vcmp.eq.s32.totalorder %v291_v1, 0  ;;  %vm313_vm1 = vcmp.eq.s32.totalorder %v291_v1, 7  ;;  %s701_s13 = sshll.u32 %s946_s18, 8  ;;  %s287_s27 = scalar_lea.vmem [#allocation8], %s689_s2 }
  0x58   : > { %v314_v25 = vrot.slane %v288_v5, 1  ;;  %v412_v32 = vld [vmem:[#allocation7 + $0x9] ss:$4 sm:$0x3]  ;;  %v1171_v41 = vand.u32 127, %v290_v0  ;;  %s554_s28 = sshll.u32 %s287_s27, 4  ;;  %s1219_s9 = scalar_lea.hbm %s1265_s4, %s701_s13  ;;  %s555_s28 = int_to_ptr.vmem [resolvable:$true] %s554_s28 }
  0x59   : > { %v304_v8 = vrot.slane %v292_v6, %v1138_v2  ;;  %v308_v11 = vrot.slane %v292_v6, %v1140_v3  ;;  %v336_v12 = vrot.slane %v331_v9, %v1138_v2  ;;  %v352_v13 = vrot.slane %v345_v10, %v1138_v2  ;;  %v343_v42 = vld [vmem:[#allocation7] ss:$4 sm:$0x3]  ;;  %v347_v44 = vld [vmem:[#allocation7 + $0x2] ss:$4 sm:$0x3] }
  0x5a   : > { %v340_v15 = vrot.slane %v331_v9, %v1140_v3  ;;  %v356_v18 = vrot.slane %v345_v10, %v1140_v3  ;;  %v326_v20 = vrot.slane %v693_v16, %v1140_v3  ;;  %v486_v24 = vrot.slane %v475_v21, %v1140_v3  ;;  %v410_v48 = vld [vmem:[#allocation7 + $0x8] ss:$4 sm:$0x3]  ;;  %v414_v61 = vld [vmem:[#allocation7 + $0xa] ss:$4 sm:$0x3] }
  0x5b   : > { %v311_v17 = vsel %vm295_vm0, %v304_v8, %v296_v7  ;;  %v312_v23 = vsel %vm295_vm0, %v308_v11, %v297_v14  ;;  %v322_v28 = vrot.slane %v693_v16, %v1138_v2  ;;  %v482_v29 = vrot.slane %v475_v21, %v1138_v2  ;;  %v473_v14 = vld [vmem:[#allocation7 + $0x10] ss:$4 sm:$0x3]  ;;  %s538_s26 = scalar_lea.sflag [#allocation4], %s1118_s0  ;;  %s866_s10 = scalar_lea.vmem %s555_s28, 256 }
  0x5c   : > { %363 = vrot.lane.b32.xlu0 %v311_v17, %s961_s8  ;;  %v359_v22 = vmul.f32 %v352_v13, %v311_v17  ;;  %387 = vrot.lane.b32.xlu1 %v311_v17, %s962_s12  ;;  %v360_v26 = vmul.f32 %v356_v18, %v312_v23  ;;  %v330_v27 = vsel %vm313_vm1, %v326_v20, %v315_v19  ;;  %vm369_vm2 = vcmp.lt.s32.totalorder %v1171_v41, 32  ;;  %p867_p1 = scmp.ne.s32.totalorder %s555_s28, %s866_s10  ;;  %s963_s18 = smov [#allocation8]  }
  0x5d   : > { %v1160_v31 = vmul.f32 %v486_v24, %v330_v27  ;;  %v329_v34 = vsel %vm313_vm1, %v322_v28, %v314_v25  ;;  %v419_v36 = vrot.slane %v412_v32, %v1138_v2  ;;  %v423_v37 = vrot.slane %v412_v32, %v1140_v3  ;;  %s870_s2 = sshll.u32 %s963_s18, 4  ;;  %s871_s2 = int_to_ptr.vmem [resolvable:$false] %s870_s2 }
  0x5e   : > { %v361_v30 = vadd.f32 %v359_v22, %v336_v12  ;;  %v362_v33 = vadd.f32 %v360_v26, %v340_v15  ;;  %v1164_v35 = vmul.f32 %v482_v29, %v329_v34  ;;  %v376_v46 = vrot.slane %v343_v42, %v1138_v2  ;;  %p868_p4 = pnand %p867_p1, %p1072_p0  ;;  %s872_s30 = scalar_lea.vmem %s871_s2, 512 }
  0x5f   : > { %v426_v38 = vmul.f32 %v419_v36, %v288_v5  ;;  %v427_v39 = vmul.f32 %v423_v37, %v289_v4  ;;  %v380_v47 = vrot.slane %v343_v42, %v1140_v3  ;;  %vm391_vm3 = vcmp.lt.s32.totalorder %v1171_v41, 96  ;;  %p873_p5 = scmp.lt.s32.totalorder %s555_s28, %s871_s2  ;;  %p874_p7 = scmp.lt.s32.totalorder %s872_s30, %s866_s10 }
  0x60   : > { %365 = vrot.lane.b32.xlu0 %v312_v23, %s961_s8  ;;  %389 = vrot.lane.b32.xlu1 %v312_v23, %s962_s12  ;;  %v398_v49 = vrot.slane %v347_v44, %v1138_v2  ;;  %v402_v50 = vrot.slane %v347_v44, %v1140_v3  ;;  %v440_v55 = vrot.slane %v410_v48, %v1138_v2  ;;  %p869_p8 = pneg %p868_p4 }
  0x61   : > { %v444_v56 = vrot.slane %v410_v48, %v1140_v3  ;;  %v461_v8 = vrot.slane %v414_v61, %v1138_v2  ;;  %v465_v9 = vrot.slane %v414_v61, %v1140_v3  ;;  %v503_v21 = vrot.slane %v473_v14, %v1138_v2  ;;  %p875_p2 = por %p874_p7, %p873_p5 }
  0x62   : > { %v507_v22 = vrot.slane %v473_v14, %v1140_v3 }
  0x63   : > { %p876_p6 = pnand %p875_p2, %p869_p8 }
  0x64   : > { %430 = vrot.lane.b32.xlu0 %v288_v5, %s961_s8  ;;  %453 = vrot.lane.b32.xlu1 %v289_v4, %s962_s12 }
  0x68   : > { %451 = vrot.lane.b32.xlu0 %v288_v5, %s962_s12  ;;  %495 = vrot.lane.b32.xlu1 %v330_v27, %s961_s8 }
  0x6c   : > { %493 = vrot.lane.b32.xlu0 %v329_v34, %s961_s8  ;;  %516 = vrot.lane.b32.xlu1 %v330_v27, %s962_s12  ;;  %v477_v27 = vld [vmem:[#allocation7 + $0x12] ss:$4 sm:$0x3] }
  0x6d   : > { %v528_v36 = vrot.slane %v477_v27, %v1140_v3 }
  0x70   : > { %514 = vrot.lane.b32.xlu0 %v329_v34, %s962_s12  ;;  %v524_v34 = vrot.slane %v477_v27, %v1138_v2 }
  0xc6   : > { %v433_v40 = vpop.permute.xlu1 %432 }
  0xce   : > { %v364_v43 = vpop.permute.xlu0 %363  ;;  %v388_v45 = vpop.permute.xlu1 %387 }
  0xd2   : > { %v366_v51 = vpop.permute.xlu0 %365  ;;  %v390_v54 = vpop.permute.xlu1 %389 }
  0xd3   : > { %v370_v52 = vsel %vm369_vm2, %v364_v43, %v366_v51  ;;  %v371_v53 = vsel %vm369_vm2, %v366_v51, %v364_v43  ;;  %v392_v59 = vsel %vm391_vm3, %v388_v45, %v390_v54  ;;  %v393_v60 = vsel %vm391_vm3, %v390_v54, %v388_v45 }
  0xd4   : > { %v383_v57 = vmul.f32 %v376_v46, %v371_v53  ;;  %v384_v58 = vmul.f32 %v380_v47, %v370_v52  ;;  %v405_v62 = vmul.f32 %v398_v49, %v392_v59  ;;  %v406_v63 = vmul.f32 %v402_v50, %v393_v60 }
  0xd6   : > { %v385_v0 = vadd.f32 %v383_v57, %v361_v30  ;;  %v386_v1 = vadd.f32 %v384_v58, %v362_v33  ;;  %v431_v4 = vpop.permute.xlu0 %430  ;;  %v454_v7 = vpop.permute.xlu1 %453 }
  0xd7   : > { %v434_v5 = vsel %vm369_vm2, %v431_v4, %v433_v40  ;;  %v435_v6 = vsel %vm369_vm2, %v433_v40, %v431_v4 }
  0xd8   : > { %v407_v10 = vadd.f32 %v405_v62, %v385_v0  ;;  %v408_v11 = vadd.f32 %v406_v63, %v386_v1  ;;  %v447_v12 = vmul.f32 %v440_v55, %v435_v6  ;;  %v448_v13 = vmul.f32 %v444_v56, %v434_v5 }
  0xda   : > { %v429_v15 = vadd.f32 %v427_v39, %v408_v11  ;;  %v428_v16 = vadd.f32 %v426_v38, %v407_v10  ;;  %v452_v17 = vpop.permute.xlu0 %451  ;;  %v496_v20 = vpop.permute.xlu1 %495 }
  0xdb   : > { %v455_v18 = vsel %vm391_vm3, %v452_v17, %v454_v7  ;;  %v456_v19 = vsel %vm391_vm3, %v454_v7, %v452_v17 }
  0xdc   : > { %v449_v23 = vadd.f32 %v447_v12, %v428_v16  ;;  %v450_v24 = vadd.f32 %v448_v13, %v429_v15  ;;  %v468_v25 = vmul.f32 %v461_v8, %v455_v18  ;;  %v469_v26 = vmul.f32 %v465_v9, %v456_v19 }
  0xde   : > { %v470_v28 = vadd.f32 %v468_v25, %v449_v23  ;;  %v471_v29 = vadd.f32 %v469_v26, %v450_v24  ;;  %v494_v30 = vpop.permute.xlu0 %493  ;;  %v517_v42 = vpop.permute.xlu1 %516 }
  0xdf   : > { %v497_v32 = vsel %vm369_vm2, %v494_v30, %v496_v20  ;;  %v498_v33 = vsel %vm369_vm2, %v496_v20, %v494_v30 }
  0xe0   : > { %v492_v37 = vadd.f32 %v1160_v31, %v471_v29  ;;  %v491_v38 = vadd.f32 %v1164_v35, %v470_v28  ;;  %v510_v39 = vmul.f32 %v503_v21, %v498_v33  ;;  %v511_v40 = vmul.f32 %v507_v22, %v497_v32 }
  0xe2   : > { %v512_v43 = vadd.f32 %v510_v39, %v491_v38  ;;  %v513_v44 = vadd.f32 %v511_v40, %v492_v37  ;;  %v515_v45 = vpop.permute.xlu0 %514 }
  0xe3   : > { %v518_v46 = vsel %vm391_vm3, %v515_v45, %v517_v42  ;;  %v519_v2 = vsel %vm391_vm3, %v517_v42, %v515_v45 }
  0xe4   : > { %v531_v3 = vmul.f32 %v524_v34, %v518_v46  ;;  %v532_v31 = vmul.f32 %v528_v36, %v519_v2 }
  0xe6   : > { %v533_v35 = vadd.f32 %v531_v3, %v512_v43  ;;  %v534_v47 = vadd.f32 %v532_v31, %v513_v44 }
  0xe8   : > { %535 = vst [vmem:[%s287_s27] sm:$0xff] %v533_v35  ;;  %536 = vst [vmem:[%s287_s27 + $0x8] sm:$0xff] %v534_v47 }
  0xe9   : > { %879 = shalt.err (!%p876_p6)
}
  0xea   : > { %s880_s22 = scalar_lea.hbm %s1219_s9, 256  ;;  %s884_s29 = scalar_lea.hbm %s1265_s4, 512 }
  0xeb   : > { %p881_p9 = scmp.ne.s32.totalorder %s1219_s9, %s880_s22  ;;  %p885_p11 = scmp.lt.s32.totalorder %s1219_s9, %s1265_s4 }
  0xec   : > { %p886_p3 = scmp.lt.s32.totalorder %s884_s29, %s880_s22 }
  0xed   : > { %p882_p12 = pnand %p881_p9, %p1072_p0 }
  0xee   : > { %p887_p1 = por %p886_p3, %p885_p11 }
  0xef   : > { %p883_p13 = pneg %p882_p12 }
  0xf1   : > { %p888_p4 = pnand %p887_p1, %p883_p13 }
  0xf3   : > { %891 = shalt.err (!%p888_p4)
}
  0xf4   : > { %710 = dma.vmem_to_hbm [thread:$0]  (%p1072_p0), %s555_s28, 256, %s1219_s9, %s538_s26  }
  0xf5 PF: > { %s566_s8 = sand.u32 1, %s934_s15   ;;  %p1281_p8 = scmp.ne.s32.totalorder %s1270_s24, 0 }
  0xf6   : > { %s567_s23 = scalar_lea.sflag [#allocation4], %s566_s8 }
  0xf7   : > { %p724_p5 = pnand %p681_p10, %p1281_p8 }
  0xf9   : > { %p725_p7 = pneg %p724_p5 }
  0xfb   : > { %929 = dma.done.wait (%p725_p7), %s567_s23, 256  }
  0xfc   : > { %931 = vsyncadd (%p725_p7), %s567_s23, 4294967040  ;;  %s23_s20 = sadd.s32 1, %s954_s20   ;;  %s1282_s11 = sld [smem:[#allocation14_spill]] }
  0xfd   : > { %p20_p2 = scmp.ge.s32.totalorder %s23_s20, 4   ;;  %s1283_s21 = sld [smem:[#allocation13_spill]] }
  0xfe   : > { %s1284_s15 = smov %s938_s16  ;;  %s1285_s16 = smov %s942_s17 }
  0xff   : > { %s1287_s18 = smov %s950_s19  ;;  %22 = sbr.rel (!%p20_p2) target bundleno = 11 (0xb), region = 107 }
 0x102   : > { %s1286_s17 = smov %s1282_s11 }
 0x103   : > { %s1288_s19 = smov %s1283_s21 }
 0x104   :  { %572 = vsyncpa [#allocation3], 1 }
 0x105   :  { %574 = vsyncpa [#allocation3 + $0x1], 1 }
 0x106   :  { %575 = vsyncpa [#allocation6], 1 }
 0x107   :  { %577 = vsyncpa [#allocation6 + $0x1], 1 }
 0x108   :  { %578 = vsyncpa [#allocation4], 1 }
 0x109   :  { %580 = vsyncpa [#allocation4 + $0x1], 1 }

</bundles_post_ra>
